<compile_context>
chip_gen: v5e
topology: v5e:2x2
jax: 0.10.0
libtpu: 0.0.40
codegen_flags: <defaults>
</compile_context>

<pallas_src>
import math

import jax
import jax.numpy as jnp
from jax import lax
from jax.experimental import pallas as pl
from jax.experimental.pallas import tpu as pltpu

_EPS = 1e-5
_BLOCK_BUDGET_BYTES = 2 * 1024 * 1024   # per activation block (x double-buffered + out)
_VMEM_LIMIT_BYTES = 32 * 1024 * 1024    # explicit scoped-VMEM request (safe on v5e..v7x)
_MIN_GRID_STEPS = 4                     # keep both v7x TCs + the DMA pipeline busy
_MAX_PACKED_LANES = 2048                # cap on lcm(C, 128) for the lane-dense path


def _round_up(v, m):
    return ((v + m - 1) // m) * m


def _cdiv(a, b):
    return (a + b - 1) // b


def _pick_row_tile(rows, row_bytes, granule):
    """Row tile: multiple of `granule`, ~<= _BLOCK_BUDGET_BYTES, >= _MIN_GRID_STEPS steps."""
    if rows <= granule:
        return rows  # single block equal to the full (tiny) array; always a legal block
    cap = max(granule, ((_BLOCK_BUDGET_BYTES // max(row_bytes, 1)) // granule) * granule)
    target = max(granule, _round_up(_cdiv(rows, _MIN_GRID_STEPS), granule))
    tm = min(cap, target, _round_up(rows, granule))
    return max(granule, tm)


# --------------------------------------------------------------------------------------
# Packed (lane-dense) kernel: P = L // C tokens per L-lane row, L = lcm(C, 128).
# --------------------------------------------------------------------------------------
def _ln_packed_kernel(x_ref, w_ref, b_ref, smean_ref, sones_ref, o_ref):
    x = x_ref[...].astype(jnp.float32)               # (TM, L): P tokens per row
    s_mean = smean_ref[...]                          # (L, P) block-diagonal 1/C
    s_ones = sones_ref[...]                          # (L, P) block-diagonal 1.0
    # Segmented per-token means on the MXU (1/C folded into the matrix).
    mu = jnp.dot(x, s_mean, preferred_element_type=jnp.float32)        # (TM, P)
    ex2 = jnp.dot(x * x, s_mean, preferred_element_type=jnp.float32)   # (TM, P)
    var = jnp.maximum(ex2 - mu * mu, 0.0)            # one-pass var, clamped (unbiased=False)
    inv = lax.rsqrt(var + _EPS)                      # EUP rsqrt on the tiny (TM, P) stats
    a = inv
    b = -mu * inv
    # Broadcast per-token scale/shift across their C lanes: (TM,P) @ (L,P)^T -> (TM,L).
    a_full = lax.dot_general(a, s_ones, (((1,), (1,)), ((), ())),
                             preferred_element_type=jnp.float32)
    b_full = lax.dot_general(b, s_ones, (((1,), (1,)), ((), ())),
                             preferred_element_type=jnp.float32)
    y = (x * a_full + b_full) * w_ref[...] + b_ref[...]
    o_ref[...] = y.astype(o_ref.dtype)


# --------------------------------------------------------------------------------------
# General kernel: any channel width, full C per block, tiled over token rows.
# --------------------------------------------------------------------------------------
def _ln_general_kernel(x_ref, w_ref, b_ref, o_ref):
    x = x_ref[...].astype(jnp.float32)               # (TM, C)
    mu = jnp.mean(x, axis=-1, keepdims=True)
    var = jnp.maximum(jnp.mean(x * x, axis=-1, keepdims=True) - mu * mu, 0.0)
    inv = lax.rsqrt(var + _EPS)
    o_ref[...] = ((x - mu) * inv * w_ref[...] + b_ref[...]).astype(o_ref.dtype)


# --------------------------------------------------------------------------------------
# Wrapper
# --------------------------------------------------------------------------------------
def _with_bias_layernorm(x, weight, bias):
    """WithBias_LayerNorm.forward: (x - mu) / sqrt(var + 1e-5) * weight + bias (last dim)."""
    weight = weight.astype(jnp.float32)
    bias = bias.astype(jnp.float32)

    # Stream bf16 / f32 natively; anything else is upcast to f32.
    if not (x.dtype == jnp.float32 or x.dtype == jnp.bfloat16):
        x = x.astype(jnp.float32)

    lead = x.shape[:-1]
    c_in = x.shape[-1]
    c_w = weight.shape[0]

    # PyTorch broadcast quirk: last dim == 1 => var == 0 and x - mu == 0, so the output is
    # exactly the broadcast bias (possibly widened to the weight's size). No kernel needed.
    if c_in == 1:
        return jnp.broadcast_to(bias, lead + (c_w,))

    assert c_in == c_w, "input channel dim must match normalized_shape"
    c = c_in
    m = 1
    for d in lead:
        m *= d
    itemsize = x.dtype.itemsize
    granule = max(8, 32 // itemsize)                 # sublane granule per dtype packing

    x2 = x.reshape(m, c)
    compiler_params = pltpu.CompilerParams(
        dimension_semantics=("parallel",),
        vmem_limit_bytes=_VMEM_LIMIT_BYTES,
    )

    # Lane-dense packed path: P tokens per L = lcm(C, 128) lanes.
    L = (c * 128) // math.gcd(c, 128)
    P = L // c
    use_packed = (P >= 2) and (L <= _MAX_PACKED_LANES) and (m >= P)

    if use_packed:
        m_body = m
        if m % P != 0:
            # Only the <= (P-1)-token remainder needs padding for the regroup (rare).
            pad = P - (m % P)
            x2 = jnp.pad(x2, ((0, pad), (0, 0)))
            m_body = m + pad
        rows = m_body // P
        xp = x2.reshape(rows, L)                     # row-major regroup (no relayout)
        tm = _pick_row_tile(rows, L * itemsize, granule)
        grid = (_cdiv(rows, tm),)                    # edge block masked by Pallas

        w_t = jnp.tile(weight.reshape(1, c), (1, P))
        b_t = jnp.tile(bias.reshape(1, c), (1, P))
        lane_seg = jnp.arange(L, dtype=jnp.int32)[:, None] // c       # (L, 1)
        seg_id = jnp.arange(P, dtype=jnp.int32)[None, :]              # (1, P)
        s_ones = (lane_seg == seg_id).astype(jnp.float32)             # (L, P)
        s_mean = s_ones * (1.0 / float(c))

        out = pl.pallas_call(
            _ln_packed_kernel,
            grid=grid,
            in_specs=[
                pl.BlockSpec((tm, L), lambda i: (i, 0)),   # packed activations
                pl.BlockSpec((1, L), lambda i: (0, 0)),    # tiled weight (resident)
                pl.BlockSpec((1, L), lambda i: (0, 0)),    # tiled bias (resident)
                pl.BlockSpec((L, P), lambda i: (0, 0)),    # segmented-mean matrix
                pl.BlockSpec((L, P), lambda i: (0, 0)),    # segmented-broadcast matrix
            ],
            out_specs=pl.BlockSpec((tm, L), lambda i: (i, 0)),
            out_shape=jax.ShapeDtypeStruct((rows, L), x.dtype),
            compiler_params=compiler_params,
        )(xp, w_t, b_t, s_mean, s_ones)
        out = out.reshape(m_body, c)
        if m_body != m:
            out = out[:m]
    else:
        tm = _pick_row_tile(m, c * itemsize, granule)
        grid = (_cdiv(m, tm),)                       # edge block masked by Pallas
        out = pl.pallas_call(
            _ln_general_kernel,
            grid=grid,
            in_specs=[
                pl.BlockSpec((tm, c), lambda i: (i, 0)),
                pl.BlockSpec((1, c), lambda i: (0, 0)),
                pl.BlockSpec((1, c), lambda i: (0, 0)),
            ],
            out_specs=pl.BlockSpec((tm, c), lambda i: (i, 0)),
            out_shape=jax.ShapeDtypeStruct((m, c), x.dtype),
            compiler_params=compiler_params,
        )(x2, weight.reshape(1, c), bias.reshape(1, c))

    return out.reshape(lead + (c,))


# Whole wrapper is jitted so constant builds / reshapes fuse with the pallas_call.
with_bias_layernorm = jax.jit(_with_bias_layernorm)


def _reference_ln(x, weight, bias):
    x = x.astype(jnp.float32)
    mu = jnp.mean(x, axis=-1, keepdims=True)
    var = jnp.mean((x - mu) ** 2, axis=-1, keepdims=True)
    return (x - mu) / jnp.sqrt(var + _EPS) * weight + bias


# --------------------------------------------------------------------------------------
if __name__ == "__main__":
    key = jax.random.PRNGKey(0)
    k1, k2, k3, k4, k5 = jax.random.split(key, 5)

    # 1) Primary VQVAE-style case: channels-last feature map, C=32 -> packed path (4x128).
    B, H, W, C = 2, 16, 16, 32
    x = jax.random.normal(k1, (B, H, W, C), jnp.float32)
    weight = jax.random.uniform(k2, (C,), jnp.float32, 0.5, 1.5)
    bias = jax.random.uniform(k3, (C,), jnp.float32, -0.5, 0.5)
    out = with_bias_layernorm(x, weight, bias)
    jax.block_until_ready(out)
    ref = _reference_ln(x, weight, bias)
    assert out.shape == ref.shape and out.dtype == x.dtype
    assert float(jnp.max(jnp.abs(out - ref))) < 1e-4

    # 2) bf16 activations: native-dtype DMA, f32 math in-kernel, bf16 store.
    xb = x.astype(jnp.bfloat16)
    outb = with_bias_layernorm(xb, weight, bias)
    jax.block_until_ready(outb)
    refb = _reference_ln(xb, weight, bias)
    assert outb.dtype == jnp.bfloat16
    assert float(jnp.max(jnp.abs(outb.astype(jnp.float32) - refb))) < 5e-2

    # 3) C=96: generalized lane-dense packing (4 tokens per 384-lane row), masked edge block.
    C2 = 96
    x2 = jax.random.normal(k4, (2, 8, 10, C2), jnp.float32)
    w2 = jnp.linspace(0.5, 1.5, C2, dtype=jnp.float32)
    b2 = jnp.linspace(-0.2, 0.2, C2, dtype=jnp.float32)
    out2 = with_bias_layernorm(x2, w2, b2)
    jax.block_until_ready(out2)
    ref2 = _reference_ln(x2, w2, b2)
    assert float(jnp.max(jnp.abs(out2 - ref2))) < 1e-4

    # 4) General (un-packed) path: lcm(C, 128) too large -> full-width rows.
    C3 = 200
    x3 = jax.random.normal(k5, (2, 5, 7, C3), jnp.float32)
    w3 = jnp.linspace(0.8, 1.2, C3, dtype=jnp.float32)
    b3 = jnp.linspace(-0.1, 0.1, C3, dtype=jnp.float32)
    out3 = with_bias_layernorm(x3, w3, b3)
    jax.block_until_ready(out3)
    ref3 = _reference_ln(x3, w3, b3)
    assert float(jnp.max(jnp.abs(out3 - ref3))) < 1e-4

    # 5) Token count not divisible by the packing factor (tiny tail pad).
    x4 = jax.random.normal(k1, (1, 3, 5, C), jnp.float32)   # 15 tokens, P=4
    out4 = with_bias_layernorm(x4, weight, bias)
    jax.block_until_ready(out4)
    ref4 = _reference_ln(x4, weight, bias)
    assert out4.shape == ref4.shape
    assert float(jnp.max(jnp.abs(out4 - ref4))) < 1e-4

    # 6) Degenerate C==1 PyTorch broadcast quirk: output is exactly the broadcast bias.
    x5 = jax.random.normal(k1, (2, 4, 4, 1), jnp.float32)
    out5 = with_bias_layernorm(x5, weight, bias)
    assert out5.shape == (2, 4, 4, C)
    assert float(jnp.max(jnp.abs(out5 - jnp.broadcast_to(bias, out5.shape)))) == 0.0

    print("KERNEL_OK")
</pallas_src>

<mosaic_0001>
module attributes {stable_mosaic.version = 11 : i64} {
  func.func @_ln_packed_kernel(%arg0: i32, %arg1: memref<32x128xf32, #tpu.memory_space<vmem>>, %arg2: memref<1x128xf32, #tpu.memory_space<vmem>>, %arg3: memref<1x128xf32, #tpu.memory_space<vmem>>, %arg4: memref<128x4xf32, #tpu.memory_space<vmem>>, %arg5: memref<128x4xf32, #tpu.memory_space<vmem>>, %arg6: memref<32x128xf32, #tpu.memory_space<vmem>>) attributes {dimension_semantics = [#tpu.dimension_semantics<parallel>], iteration_bounds = array<i64: 4>, scalar_prefetch = 0 : i64, scratch_operands = 0 : i64, tpu.core_type = #tpu.core_type<tc>, window_params = [{transform_indices = @transform_0, window_bounds = array<i64: 32, 128>}, {pipeline_mode = #tpu.pipeline_mode<synchronous>, transform_indices = @transform_1, window_bounds = array<i64: 1, 128>}, {pipeline_mode = #tpu.pipeline_mode<synchronous>, transform_indices = @transform_2, window_bounds = array<i64: 1, 128>}, {pipeline_mode = #tpu.pipeline_mode<synchronous>, transform_indices = @transform_3, window_bounds = array<i64: 128, 4>}, {pipeline_mode = #tpu.pipeline_mode<synchronous>, transform_indices = @transform_4, window_bounds = array<i64: 128, 4>}, {transform_indices = @transform_5, window_bounds = array<i64: 32, 128>}]} {
    %c0 = arith.constant 0 : index
    %c0_0 = arith.constant 0 : index
    %0 = vector.load %arg1[%c0, %c0_0] : memref<32x128xf32, #tpu.memory_space<vmem>>, vector<32x128xf32>
    %c0_1 = arith.constant 0 : index
    %c0_2 = arith.constant 0 : index
    %1 = vector.load %arg4[%c0_1, %c0_2] : memref<128x4xf32, #tpu.memory_space<vmem>>, vector<128x4xf32>
    %c0_3 = arith.constant 0 : index
    %c0_4 = arith.constant 0 : index
    %2 = vector.load %arg5[%c0_3, %c0_4] : memref<128x4xf32, #tpu.memory_space<vmem>>, vector<128x4xf32>
    %cst = arith.constant dense<0.000000e+00> : vector<32x4xf32>
    %3 = tpu.matmul %0, %1, %cst {dimension_numbers = #tpu.dot_dimension_numbers<[1], [0], [0], [1], [0, 0, 1, 1], [], []>} : vector<32x128xf32>, vector<128x4xf32>, vector<32x4xf32> -> vector<32x4xf32>
    %4 = arith.mulf %0, %0 : vector<32x128xf32>
    %cst_5 = arith.constant dense<0.000000e+00> : vector<32x4xf32>
    %5 = tpu.matmul %4, %1, %cst_5 {dimension_numbers = #tpu.dot_dimension_numbers<[1], [0], [0], [1], [0, 0, 1, 1], [], []>} : vector<32x128xf32>, vector<128x4xf32>, vector<32x4xf32> -> vector<32x4xf32>
    %6 = arith.mulf %3, %3 : vector<32x4xf32>
    %7 = arith.subf %5, %6 : vector<32x4xf32>
    %cst_6 = arith.constant 0.000000e+00 : f32
    %8 = vector.broadcast %cst_6 : f32 to vector<32x4xf32>
    %9 = arith.maximumf %7, %8 : vector<32x4xf32>
    %cst_7 = arith.constant 9.99999974E-6 : f32
    %10 = vector.broadcast %cst_7 : f32 to vector<32x4xf32>
    %11 = arith.addf %9, %10 : vector<32x4xf32>
    %12 = math.rsqrt %11 : vector<32x4xf32>
    %cst_8 = arith.constant 0.000000e+00 : f32
    %13 = vector.broadcast %cst_8 : f32 to vector<32x4xf32>
    %14 = arith.subf %13, %3 : vector<32x4xf32>
    %15 = arith.mulf %14, %12 : vector<32x4xf32>
    %cst_9 = arith.constant dense<0.000000e+00> : vector<32x128xf32>
    %16 = tpu.matmul %12, %2, %cst_9 {dimension_numbers = #tpu.dot_dimension_numbers<[1], [1], [0], [0], [0, 0, 1, 0], [], []>} : vector<32x4xf32>, vector<128x4xf32>, vector<32x128xf32> -> vector<32x128xf32>
    %cst_10 = arith.constant dense<0.000000e+00> : vector<32x128xf32>
    %17 = tpu.matmul %15, %2, %cst_10 {dimension_numbers = #tpu.dot_dimension_numbers<[1], [1], [0], [0], [0, 0, 1, 0], [], []>} : vector<32x4xf32>, vector<128x4xf32>, vector<32x128xf32> -> vector<32x128xf32>
    %18 = arith.mulf %0, %16 : vector<32x128xf32>
    %19 = arith.addf %18, %17 : vector<32x128xf32>
    %c0_11 = arith.constant 0 : index
    %c0_12 = arith.constant 0 : index
    %20 = vector.load %arg2[%c0_11, %c0_12] : memref<1x128xf32, #tpu.memory_space<vmem>>, vector<1x128xf32>
    %21 = vector.broadcast %20 : vector<1x128xf32> to vector<32x128xf32>
    %22 = arith.mulf %19, %21 : vector<32x128xf32>
    %c0_13 = arith.constant 0 : index
    %c0_14 = arith.constant 0 : index
    %23 = vector.load %arg3[%c0_13, %c0_14] : memref<1x128xf32, #tpu.memory_space<vmem>>, vector<1x128xf32>
    %24 = vector.broadcast %23 : vector<1x128xf32> to vector<32x128xf32>
    %25 = arith.addf %22, %24 : vector<32x128xf32>
    %c0_15 = arith.constant 0 : index
    %c0_16 = arith.constant 0 : index
    %26 = vector.load %arg6[%c0_15, %c0_16] : memref<32x128xf32, #tpu.memory_space<vmem>>, vector<32x128xf32>
    tpu.vector_store %arg6[%c0_15, %c0_16], %25 {strides = array<i32>} : memref<32x128xf32, #tpu.memory_space<vmem>>, vector<32x128xf32>,
    return
  }
  func.func @transform_0(%arg0: i32) -> (i32, i32) {
    %c0_i32 = arith.constant 0 : i32
    %c0_i32_0 = arith.constant 0 : i32
    return %arg0, %c0_i32 : i32, i32
  }
  func.func @transform_1(%arg0: i32) -> (i32, i32) {
    %c0_i32 = arith.constant 0 : i32
    %c0_i32_0 = arith.constant 0 : i32
    %c0_i32_1 = arith.constant 0 : i32
    return %c0_i32, %c0_i32_0 : i32, i32
  }
  func.func @transform_2(%arg0: i32) -> (i32, i32) {
    %c0_i32 = arith.constant 0 : i32
    %c0_i32_0 = arith.constant 0 : i32
    %c0_i32_1 = arith.constant 0 : i32
    return %c0_i32, %c0_i32_0 : i32, i32
  }
  func.func @transform_3(%arg0: i32) -> (i32, i32) {
    %c0_i32 = arith.constant 0 : i32
    %c0_i32_0 = arith.constant 0 : i32
    %c0_i32_1 = arith.constant 0 : i32
    return %c0_i32, %c0_i32_0 : i32, i32
  }
  func.func @transform_4(%arg0: i32) -> (i32, i32) {
    %c0_i32 = arith.constant 0 : i32
    %c0_i32_0 = arith.constant 0 : i32
    %c0_i32_1 = arith.constant 0 : i32
    return %c0_i32, %c0_i32_0 : i32, i32
  }
  func.func @transform_5(%arg0: i32) -> (i32, i32) {
    %c0_i32 = arith.constant 0 : i32
    %c0_i32_0 = arith.constant 0 : i32
    return %arg0, %c0_i32 : i32, i32
  }
}

</mosaic_0001>

<bundles_post_ra>
// kernel: _with_bias_layernorm.1
= control target key start
LH: loop header
LB: loop body
LE: loop exit
PB: predicated region body
PF: predicated region fallthrough
CT: control target
= control target key end

     0   :  { %s712_s18 = smov 0   ;;  %s908_s0 = inlined_call_operand.vmem [shape: f32[128,128], index: 0, kind: input, shape index: {}]   ;;  %s909_s1 = inlined_call_operand.vmem [shape: f32[1,128], index: 1, kind: input, shape index: {}]   ;;  %s910_s2 = inlined_call_operand.vmem [shape: f32[1,128], index: 2, kind: input, shape index: {}]   ;;  %s911_s3 = inlined_call_operand.vmem [shape: f32[128,4], index: 3, kind: input, shape index: {}]   ;;  %s912_s4 = inlined_call_operand.vmem [shape: f32[128,4], index: 4, kind: input, shape index: {}]   ;;  %s913_s5 = inlined_call_operand.vmem [shape: f32[128,128], index: 5, kind: output, shape index: {}]  }
   0x1 LB: > { %s605_s19 = sadd.s32 4294967295, %s680_s18   ;;  %p609_p0 = scmp.ge.s32.totalorder %s680_s18, 1  ;;  %s680_s18 = sphi %s712_s18, %s15_s18  }
   0x2   : > { %p188_p1 = scmp.lt.s32.totalorder %s680_s18, 5 }
   0x4   : > { %p189_p2 = pnand %p609_p0, %p188_p1 }
   0x5   : > { %s610_s7 = sshll.u32 (!%p189_p2), %s605_s19, 2 }
   0x6   : > { %192 = sbr.rel (%p189_p2) target bundleno = 360 (0x168), region = 40  ;;  %p217_p3 = scmp.lt.s32.totalorder (!%p189_p2), %s610_s7, 15 }
   0xb   : > { %v247_v0 = vld [vmem:[%s911_s3 + $0x78] sm:$0xff]  ;;  %v246_v1 = vld [vmem:[%s911_s3 + $0x70] sm:$0xff]  ;;  %v245_v2 = vld [vmem:[%s911_s3 + $0x68] sm:$0xff]  ;;  %s915_s7 = smov (!%p217_p3, %s610_s7), 15  ;;  %vm390_vm0 = vcmask 31744  }
   0xc   : > { %264 = vmatpush.msra.mxu0 %v247_v0  ;;  %297 = vmatpush.msra.mxu1 %v247_v0  ;;  %v244_v3 = vld [vmem:[%s911_s3 + $0x60] sm:$0xff]  ;;  %v243_v4 = vld [vmem:[%s911_s3 + $0x58] sm:$0xff]  ;;  %v242_v5 = vld [vmem:[%s911_s3 + $0x50] sm:$0xff]  ;;  %s611_s19 = sshll.u32 %s915_s7, 3 }
   0xd   : > { %v241_v6 = vld [vmem:[%s911_s3 + $0x48] sm:$0xff]  ;;  %v240_v7 = vld [vmem:[%s911_s3 + $0x40] sm:$0xff]  ;;  %v239_v8 = vld [vmem:[%s911_s3 + $0x38] sm:$0xff]  ;;  %s767_s26 = scalar_lea.vmem %s908_s0, %s611_s19  ;;  %s226_s28 = scalar_lea.vmem %s913_s5, %s611_s19 }
   0xe   : > { %265 = vmatpush.msra.mxu0 %v246_v1  ;;  %298 = vmatpush.msra.mxu1 %v246_v1  ;;  %v238_v9 = vld [vmem:[%s911_s3 + $0x30] sm:$0xff]  ;;  %v237_v10 = vld [vmem:[%s911_s3 + $0x28] sm:$0xff]  ;;  %v236_v11 = vld [vmem:[%s911_s3 + $0x20] sm:$0xff] }
   0xf   : > { %v235_v12 = vld [vmem:[%s911_s3 + $0x18] sm:$0xff]  ;;  %v234_v13 = vld [vmem:[%s911_s3 + $0x10] sm:$0xff]  ;;  %v776_v15 = vld [vmem:[%s767_s26] sm:$0xff] }
  0x10   : > { %266 = vmatpush.msra.mxu0 %v245_v2  ;;  %299 = vmatpush.msra.mxu1 %v245_v2  ;;  %v263_v14 = vld [vmem:[%s912_s4 + $0x78] sm:$0xff]  ;;  %v233_v16 = vld [vmem:[%s911_s3 + $0x8] sm:$0xff]  ;;  %v262_v17 = vld [vmem:[%s912_s4 + $0x70] sm:$0xff]  ;;  %v293_v19 = vmul.f32 %v776_v15, %v776_v15 }
  0x11   : > { %614 = vmatpush.xpose.msk.msra.mxu2 %vm390_vm0, %v263_v14  ;;  %634 = vmatpush.xpose.msk.msra.mxu3 %vm390_vm0, %v263_v14  ;;  %v232_v18 = vld [vmem:[%s911_s3] sm:$0xff]  ;;  %v261_v20 = vld [vmem:[%s912_s4 + $0x68] sm:$0xff]  ;;  %v259_v24 = vld [vmem:[%s912_s4 + $0x58] sm:$0xff] }
  0x12   : > { %267 = vmatpush.msra.mxu0 %v244_v3  ;;  %300 = vmatpush.msra.mxu1 %v244_v3  ;;  %v798_v21 = vld [vmem:[%s767_s26 + $0x8] sm:$0xff]  ;;  %v260_v22 = vld [vmem:[%s912_s4 + $0x60] sm:$0xff]  ;;  %v814_v25 = vld [vmem:[%s767_s26 + $0x10] sm:$0xff] }
  0x13   : > { %v294_v23 = vmul.f32 %v798_v21, %v798_v21  ;;  %v258_v26 = vld [vmem:[%s912_s4 + $0x50] sm:$0xff]  ;;  %v295_v27 = vmul.f32 %v814_v25, %v814_v25  ;;  %v257_v28 = vld [vmem:[%s912_s4 + $0x48] sm:$0xff]  ;;  %v830_v29 = vld [vmem:[%s767_s26 + $0x18] sm:$0xff] }
  0x14   : > { %268 = vmatpush.msra.mxu0 %v243_v4  ;;  %301 = vmatpush.msra.mxu1 %v243_v4  ;;  %v256_v30 = vld [vmem:[%s912_s4 + $0x40] sm:$0xff]  ;;  %v296_v31 = vmul.f32 %v830_v29, %v830_v29  ;;  %v255_v32 = vld [vmem:[%s912_s4 + $0x38] sm:$0xff]  ;;  %v254_v33 = vld [vmem:[%s912_s4 + $0x30] sm:$0xff] }
  0x15   : > { %615 = vmatpush.xpose.msk.msra.mxu2 %vm390_vm0, %v262_v17  ;;  %635 = vmatpush.xpose.msk.msra.mxu3 %vm390_vm0, %v262_v17  ;;  %v253_v34 = vld [vmem:[%s912_s4 + $0x28] sm:$0xff]  ;;  %v252_v35 = vld [vmem:[%s912_s4 + $0x20] sm:$0xff]  ;;  %v251_v36 = vld [vmem:[%s912_s4 + $0x18] sm:$0xff] }
  0x16   : > { %269 = vmatpush.msra.mxu0 %v242_v5  ;;  %302 = vmatpush.msra.mxu1 %v242_v5  ;;  %v250_v37 = vld [vmem:[%s912_s4 + $0x10] sm:$0xff]  ;;  %v249_v38 = vld [vmem:[%s912_s4 + $0x8] sm:$0xff]  ;;  %v248_v39 = vld [vmem:[%s912_s4] sm:$0xff] }
  0x18   : > { %270 = vmatpush.msra.mxu0 %v241_v6  ;;  %303 = vmatpush.msra.mxu1 %v241_v6 }
  0x19   : > { %616 = vmatpush.xpose.msk.msra.mxu2 %vm390_vm0, %v261_v20  ;;  %636 = vmatpush.xpose.msk.msra.mxu3 %vm390_vm0, %v261_v20 }
  0x1a   : > { %271 = vmatpush.msra.mxu0 %v240_v7  ;;  %304 = vmatpush.msra.mxu1 %v240_v7 }
  0x1c   : > { %272 = vmatpush.msra.mxu0 %v239_v8  ;;  %305 = vmatpush.msra.mxu1 %v239_v8 }
  0x1d   : > { %617 = vmatpush.xpose.msk.msra.mxu2 %vm390_vm0, %v260_v22  ;;  %637 = vmatpush.xpose.msk.msra.mxu3 %vm390_vm0, %v260_v22 }
  0x1e   : > { %273 = vmatpush.msra.mxu0 %v238_v9  ;;  %306 = vmatpush.msra.mxu1 %v238_v9 }
  0x20   : > { %274 = vmatpush.msra.mxu0 %v237_v10  ;;  %307 = vmatpush.msra.mxu1 %v237_v10 }
  0x21   : > { %618 = vmatpush.xpose.msk.msra.mxu2 %vm390_vm0, %v259_v24  ;;  %638 = vmatpush.xpose.msk.msra.mxu3 %vm390_vm0, %v259_v24 }
  0x22   : > { %275 = vmatpush.msra.mxu0 %v236_v11  ;;  %308 = vmatpush.msra.mxu1 %v236_v11 }
  0x24   : > { %276 = vmatpush.msra.mxu0 %v235_v12  ;;  %309 = vmatpush.msra.mxu1 %v235_v12 }
  0x25   : > { %619 = vmatpush.xpose.msk.msra.mxu2 %vm390_vm0, %v258_v26  ;;  %639 = vmatpush.xpose.msk.msra.mxu3 %vm390_vm0, %v258_v26 }
  0x26   : > { %277 = vmatpush.msra.mxu0 %v234_v13  ;;  %310 = vmatpush.msra.mxu1 %v234_v13 }
  0x28   : > { %278 = vmatpush.msra.mxu0 %v233_v16  ;;  %311 = vmatpush.msra.mxu1 %v233_v16 }
  0x29   : > { %620 = vmatpush.xpose.msk.msra.mxu2 %vm390_vm0, %v257_v28  ;;  %640 = vmatpush.xpose.msk.msra.mxu3 %vm390_vm0, %v257_v28 }
  0x2a   : > { %279 = vmatpush.msra.mxu0 %v232_v18  ;;  %312 = vmatpush.msra.mxu1 %v232_v18 }
  0x2b   : > { %280 = vmatmul.f32.vlgmr.msra.gmra.mxu0 %v776_v15  ;;  %313 = vmatmul.f32.vlgmr.msra.gmra.mxu1 %v293_v19 }
  0x2d   : > { %621 = vmatpush.xpose.msk.msra.mxu2 %vm390_vm0, %v256_v30  ;;  %641 = vmatpush.xpose.msk.msra.mxu3 %vm390_vm0, %v256_v30 }
  0x31   : > { %622 = vmatpush.xpose.msk.msra.mxu2 %vm390_vm0, %v255_v32  ;;  %642 = vmatpush.xpose.msk.msra.mxu3 %vm390_vm0, %v255_v32 }
  0x33   : > { %283 = vmatmul.f32.gmra.mxu0 %v798_v21  ;;  %316 = vmatmul.f32.gmra.mxu1 %v294_v23 }
  0x35   : > { %623 = vmatpush.xpose.msk.msra.mxu2 %vm390_vm0, %v254_v33  ;;  %643 = vmatpush.xpose.msk.msra.mxu3 %vm390_vm0, %v254_v33 }
  0x39   : > { %624 = vmatpush.xpose.msk.msra.mxu2 %vm390_vm0, %v253_v34  ;;  %644 = vmatpush.xpose.msk.msra.mxu3 %vm390_vm0, %v253_v34 }
  0x3b   : > { %286 = vmatmul.f32.gmra.mxu0 %v814_v25  ;;  %319 = vmatmul.f32.gmra.mxu1 %v295_v27 }
  0x3d   : > { %625 = vmatpush.xpose.msk.msra.mxu2 %vm390_vm0, %v252_v35  ;;  %645 = vmatpush.xpose.msk.msra.mxu3 %vm390_vm0, %v252_v35 }
  0x41   : > { %626 = vmatpush.xpose.msk.msra.mxu2 %vm390_vm0, %v251_v36  ;;  %646 = vmatpush.xpose.msk.msra.mxu3 %vm390_vm0, %v251_v36 }
  0x43   : > { %289 = vmatmul.f32.gmra.mxu0 %v830_v29  ;;  %322 = vmatmul.f32.gmra.mxu1 %v296_v31 }
  0x45   : > { %627 = vmatpush.xpose.msk.msra.mxu2 %vm390_vm0, %v250_v37  ;;  %647 = vmatpush.xpose.msk.msra.mxu3 %vm390_vm0, %v250_v37 }
  0x49   : > { %628 = vmatpush.xpose.msk.msra.mxu2 %vm390_vm0, %v249_v38  ;;  %648 = vmatpush.xpose.msk.msra.mxu3 %vm390_vm0, %v249_v38 }
  0x4d   : > { %629 = vmatpush.xpose.msk.msra.mxu2 %vm390_vm0, %v248_v39  ;;  %649 = vmatpush.xpose.msk.msra.mxu3 %vm390_vm0, %v248_v39 }
  0xa8   : > { %v281_v40 = vpop.f32.mrf.mxu0  ;;  %v314_v41 = vpop.f32.mrf.mxu1 }
  0xa9   : > { %v326_v42 = vmul.f32 %v281_v40, %v281_v40  ;;  %v382_v4 = vsub.f32 0.0, %v281_v40 }
  0xab   : > { %v330_v43 = vsub.f32 %v314_v41, %v326_v42  ;;  %v664_v42 = vld [vmem:[%s909_s1] ss:$0 sm:$0xff] }
  0xad   : > { %v334_v44 = vmax.f32 %v330_v43, 0.0 }
  0xaf   : > { %v338_v45 = vadd.f32 1e-05, %v334_v44 }
  0xb0   : > { %v284_v46 = vpop.f32.mrf.mxu0  ;;  %v317_v47 = vpop.f32.mrf.mxu1 }
  0xb1   : > { %666 = vrsqrt.f32 %v338_v45  ;;  %v327_v48 = vmul.f32 %v284_v46, %v284_v46  ;;  %vm348_vm2 = vweird.f32 %v338_v45  ;;  %v383_v18 = vsub.f32 0.0, %v284_v46 }
  0xb3   : > { %v331_v49 = vsub.f32 %v317_v47, %v327_v48 }
  0xb5   : > { %v335_v50 = vmax.f32 %v331_v49, 0.0 }
  0xb7   : > { %v667_v51 = vpop.eup %666  ;;  %v339_v52 = vadd.f32 1e-05, %v335_v50 }
  0xb8   : > { %v343_v53 = vmul.f32 %v667_v51, %v338_v45  ;;  %v287_v54 = vpop.f32.mrf.mxu0  ;;  %v320_v55 = vpop.f32.mrf.mxu1  ;;  %vm349_vm1 = vweird.f32 %v667_v51  ;;  %v665_v45 = vld [vmem:[%s910_s2] ss:$0 sm:$0xff] }
  0xb9   : > { %668 = vrsqrt.f32 %v339_v52  ;;  %v328_v56 = vmul.f32 %v287_v54, %v287_v54  ;;  %vm350_vm3 = vmor %vm348_vm2, %vm349_vm1  ;;  %vm358_vm5 = vweird.f32 %v339_v52  ;;  %v384_v30 = vsub.f32 0.0, %v287_v54 }
  0xba   : > { %v344_v57 = vmul.f32 %v667_v51, %v343_v53 }
  0xbb   : > { %v332_v58 = vsub.f32 %v320_v55, %v328_v56 }
  0xbc   : > { %v345_v59 = vmul.f32 0.5, %v344_v57 }
  0xbd   : > { %v336_v60 = vmax.f32 %v332_v58, 0.0 }
  0xbe   : > { %v346_v61 = vsub.f32 1.5, %v345_v59 }
  0xbf   : > { %v669_v62 = vpop.eup %668  ;;  %v340_v63 = vadd.f32 1e-05, %v336_v60 }
  0xc0   : > { %v353_v0 = vmul.f32 %v669_v62, %v339_v52  ;;  %v290_v1 = vpop.f32.mrf.mxu0  ;;  %v323_v2 = vpop.f32.mrf.mxu1  ;;  %v347_v3 = vmul.f32 %v667_v51, %v346_v61  ;;  %vm359_vm4 = vweird.f32 %v669_v62 }
  0xc1   : > { %670 = vrsqrt.f32 %v340_v63  ;;  %v329_v5 = vmul.f32 %v290_v1, %v290_v1  ;;  %vm360_vm6 = vmor %vm358_vm5, %vm359_vm4  ;;  %vm368_vm8 = vweird.f32 %v340_v63  ;;  %v385_v37 = vsub.f32 0.0, %v290_v1 }
  0xc2   : > { %v354_v6 = vmul.f32 %v669_v62, %v353_v0  ;;  %v351_v7 = vsel %vm350_vm3, %v667_v51, %v347_v3 }
  0xc3   : > { %v333_v8 = vsub.f32 %v323_v2, %v329_v5  ;;  %v386_v9 = vmul.f32 %v382_v4, %v351_v7  ;;  %630 = vmatmul.msk.f32.vlgmr.msra.gmra.mxu2 %vm390_vm0, %v351_v7 }
  0xc4   : > { %v355_v10 = vmul.f32 0.5, %v354_v6 }
  0xc5   : > { %v337_v11 = vmax.f32 %v333_v8, 0.0  ;;  %650 = vmatmul.msk.f32.vlgmr.msra.gmra.mxu3 %vm390_vm0, %v386_v9 }
  0xc6   : > { %v356_v12 = vsub.f32 1.5, %v355_v10 }
  0xc7   : > { %v671_v13 = vpop.eup %670  ;;  %v341_v14 = vadd.f32 1e-05, %v337_v11 }
  0xc8   : > { %v363_v16 = vmul.f32 %v671_v13, %v340_v63  ;;  %v357_v17 = vmul.f32 %v669_v62, %v356_v12  ;;  %vm369_vm7 = vweird.f32 %v671_v13 }
  0xc9   : > { %672 = vrsqrt.f32 %v341_v14  ;;  %vm370_vm9 = vmor %vm368_vm8, %vm369_vm7  ;;  %vm378_vm11 = vweird.f32 %v341_v14 }
  0xca   : > { %v364_v19 = vmul.f32 %v671_v13, %v363_v16  ;;  %v361_v20 = vsel %vm360_vm6, %v669_v62, %v357_v17 }
  0xcb   : > { %v387_v22 = vmul.f32 %v383_v18, %v361_v20  ;;  %631 = vmatmul.msk.f32.gmra.mxu2 %vm390_vm0, %v361_v20 }
  0xcc   : > { %v365_v23 = vmul.f32 0.5, %v364_v19 }
  0xcd   : > { %651 = vmatmul.msk.f32.gmra.mxu3 %vm390_vm0, %v387_v22 }
  0xce   : > { %v366_v24 = vsub.f32 1.5, %v365_v23 }
  0xcf   : > { %v673_v26 = vpop.eup %672 }
  0xd0   : > { %v373_v27 = vmul.f32 %v673_v26, %v341_v14  ;;  %v367_v28 = vmul.f32 %v671_v13, %v366_v24  ;;  %vm379_vm10 = vweird.f32 %v673_v26 }
  0xd1   : > { %vm380_vm12 = vmor %vm378_vm11, %vm379_vm10 }
  0xd2   : > { %v374_v31 = vmul.f32 %v673_v26, %v373_v27  ;;  %v371_v32 = vsel %vm370_vm9, %v671_v13, %v367_v28 }
  0xd3   : > { %v388_v33 = vmul.f32 %v384_v30, %v371_v32  ;;  %632 = vmatmul.msk.f32.gmra.mxu2 %vm390_vm0, %v371_v32 }
  0xd4   : > { %v375_v34 = vmul.f32 0.5, %v374_v31 }
  0xd5   : > { %652 = vmatmul.msk.f32.gmra.mxu3 %vm390_vm0, %v388_v33 }
  0xd6   : > { %v376_v35 = vsub.f32 1.5, %v375_v34 }
  0xd8   : > { %v377_v36 = vmul.f32 %v673_v26, %v376_v35 }
  0xda   : > { %v381_v38 = vsel %vm380_vm12, %v673_v26, %v377_v36 }
  0xdb   : > { %v389_v39 = vmul.f32 %v385_v37, %v381_v38  ;;  %633 = vmatmul.msk.f32.gmra.mxu2 %vm390_vm0, %v381_v38 }
  0xdd   : > { %653 = vmatmul.msk.f32.gmra.mxu3 %vm390_vm0, %v389_v39 }
 0x146   : > { %v468_v40 = vpop.f32.mrf.mxu2 }
 0x147   : > { %v521_v41 = vmul.f32 %v468_v40, %v776_v15 }
 0x148   : > { %v509_v43 = vpop.f32.mrf.mxu3 }
 0x149   : > { %v525_v44 = vadd.f32 %v521_v41, %v509_v43 }
 0x14b   : > { %v533_v46 = vmul.f32 %v664_v42, %v525_v44 }
 0x14d   : > { %v541_v47 = vadd.f32 %v665_v45, %v533_v46 }
 0x14e   : > { %v471_v48 = vpop.f32.mrf.mxu2 }
 0x14f   : > { %545 = vst [vmem:[%s226_s28] sm:$0xff] %v541_v47  ;;  %v522_v15 = vmul.f32 %v471_v48, %v798_v21 }
 0x150   : > { %v512_v49 = vpop.f32.mrf.mxu3 }
 0x151   : > { %v526_v50 = vadd.f32 %v522_v15, %v512_v49 }
 0x153   : > { %v534_v51 = vmul.f32 %v664_v42, %v526_v50 }
 0x155   : > { %v542_v52 = vadd.f32 %v665_v45, %v534_v51 }
 0x156   : > { %v474_v53 = vpop.f32.mrf.mxu2 }
 0x157   : > { %546 = vst [vmem:[%s226_s28 + $0x8] sm:$0xff] %v542_v52  ;;  %v523_v54 = vmul.f32 %v474_v53, %v814_v25 }
 0x158   : > { %v515_v55 = vpop.f32.mrf.mxu3 }
 0x159   : > { %v527_v56 = vadd.f32 %v523_v54, %v515_v55 }
 0x15b   : > { %v535_v57 = vmul.f32 %v664_v42, %v527_v56 }
 0x15d   : > { %v543_v58 = vadd.f32 %v665_v45, %v535_v57 }
 0x15e   : > { %v477_v59 = vpop.f32.mrf.mxu2 }
 0x15f   : > { %547 = vst [vmem:[%s226_s28 + $0x10] sm:$0xff] %v543_v58  ;;  %v524_v60 = vmul.f32 %v477_v59, %v830_v29 }
 0x160   : > { %v518_v61 = vpop.f32.mrf.mxu3 }
 0x161   : > { %v528_v62 = vadd.f32 %v524_v60, %v518_v61 }
 0x163   : > { %v536_v63 = vmul.f32 %v664_v42, %v528_v62 }
 0x165   : > { %v544_v21 = vadd.f32 %v665_v45, %v536_v63 }
 0x167   : > { %548 = vst [vmem:[%s226_s28 + $0x18] sm:$0xff] %v544_v21 }
 0x168 PF: > { %s15_s18 = sadd.s32 1, %s680_s18  }
 0x169   : > { %p12_p4 = scmp.ge.s32.totalorder %s15_s18, 6  }
 0x16b   :  { %14 = sbr.rel (!%p12_p4) target bundleno = 1 (0x1), region = 70 }

</bundles_post_ra>
